<compile_context>
chip_gen: v6e
topology: v6e:2x2x1
jax: 0.10.0
libtpu: 0.0.40
codegen_flags: <defaults>
</compile_context>

<pallas_src>
import jax
import jax.numpy as jnp
from jax.experimental import pallas as pl
from jax.experimental.pallas import tpu as pltpu

EPS = 1e-5
LANES = 128


def _round_up(a, m):
    return ((a + m - 1) // m) * m


def _choose_tile(packed_rows, cap):
    """Tile (multiple of 16) giving >=2 (preferably even) balanced grid tiles."""
    cap = max(16, (cap // 16) * 16)
    n = max(2, pl.cdiv(packed_rows, cap))
    if n % 2:
        n += 1
    tile = min(cap, _round_up(pl.cdiv(packed_rows, n), 16))
    return max(tile, 16)


def prenorm_kernel(x_ref, seg_ref, w_ref, aff_ref, o_ref):
    x_bf = x_ref[...]                                  # (T, PD) bf16, lane-dense
    x = x_bf.astype(jnp.float32)                       # f32 element-wise path (v5e-safe)
    seg = seg_ref[...]                                 # (PD, PD) bf16 block-diag(1/D)

    # Per-segment mean: single-pass bf16 MXU dot, f32 accumulation (exact: 1/D = 2^-5).
    mean = jnp.dot(x_bf, seg, preferred_element_type=jnp.float32)
    centered = x - mean
    # Per-segment variance: centered^2 rounded to bf16 for a single-pass dot; the
    # ~1e-3 relative error on var is below the bf16 rounding of x_norm below.
    c2 = (centered * centered).astype(jnp.bfloat16)
    var = jnp.dot(c2, seg, preferred_element_type=jnp.float32)

    gamma = aff_ref[0:1, :]                            # packed (8, PD) resident block
    beta = aff_ref[1:2, :]
    bias = aff_ref[2:3, :]
    x_norm = centered * jax.lax.rsqrt(var + EPS) * gamma + beta   # f32; rsqrt -> EUP slot

    # Sublayer (Linear) on the packed layout: block-diagonal bf16 W replica,
    # single MXU pass with f32 accumulation.
    y = jnp.dot(x_norm.astype(jnp.bfloat16), w_ref[...],
                preferred_element_type=jnp.float32) + bias
    o_ref[...] = y.astype(o_ref.dtype)


def prepare_params(w, b, gamma, beta):
    """Hoisted parameter prep: block-diagonal seg / W replicas + packed affine block."""
    D = gamma.shape[0]
    assert w.shape == (D, D) and b.shape == (D,) and beta.shape == (D,)
    P = LANES // D if LANES % D == 0 else 1
    PD = P * D
    eye_p = jnp.eye(P, dtype=jnp.float32)
    seg = jnp.kron(eye_p, jnp.full((D, D), 1.0 / D, jnp.float32)).astype(jnp.bfloat16)
    w_big = jnp.kron(eye_p, w.astype(jnp.float32)).astype(jnp.bfloat16)
    affine = jnp.zeros((8, PD), jnp.float32)
    affine = affine.at[0].set(jnp.tile(gamma.astype(jnp.float32), P))
    affine = affine.at[1].set(jnp.tile(beta.astype(jnp.float32), P))
    affine = affine.at[2].set(jnp.tile(b.astype(jnp.float32), P))
    return seg, w_big, affine


def _pre_norm(x, seg, w_big, affine, *, tile_cap=1024):
    """x: (B, S, D) float32.  Returns Linear(LayerNorm(x)) (PreNorm semantics)."""
    B, S, D = x.shape
    PD = w_big.shape[0]
    P = PD // D
    assert PD == P * D and seg.shape == (PD, PD) and affine.shape == (8, PD)

    rows = B * S
    packed_rows = pl.cdiv(rows, P)
    tile = _choose_tile(packed_rows, tile_cap)
    n_tiles = pl.cdiv(packed_rows, tile)

    x2 = x.reshape(rows, D)
    if rows % P:
        # Only P-1 extra rows, needed for the packing reshape; fuses with the bf16 cast.
        x2 = jnp.pad(x2, ((0, packed_rows * P - rows), (0, 0)))
    xp = x2.reshape(packed_rows, PD).astype(jnp.bfloat16)   # lane-dense bf16 slab

    row_spec = pl.BlockSpec((tile, PD), lambda i: (i, 0))
    resident = lambda shape: pl.BlockSpec(shape, lambda i: (0, 0))

    cost = pl.CostEstimate(
        flops=3 * 2 * packed_rows * PD * PD,
        transcendentals=packed_rows * PD,
        bytes_accessed=packed_rows * PD * (2 + 4) + 2 * PD * PD * 2 + 8 * PD * 4,
    )

    out = pl.pallas_call(
        prenorm_kernel,
        out_shape=jax.ShapeDtypeStruct((packed_rows, PD), x.dtype),
        grid=(n_tiles,),
        in_specs=[
            row_spec,                 # x (packed bf16, streamed per tile)
            resident((PD, PD)),       # segment-mean matrix (bf16, resident)
            resident((PD, PD)),       # block-diagonal W (bf16, resident)
            resident((8, PD)),        # gamma/beta/bias packed block (f32, resident)
        ],
        out_specs=row_spec,
        compiler_params=pltpu.CompilerParams(
            dimension_semantics=("parallel",),
        ),
        cost_estimate=cost,
    )(xp, seg, w_big, affine)

    out = out.reshape(packed_rows * P, D)
    if packed_rows * P != rows:
        out = out[:rows]
    return out.reshape(B, S, D)


pre_norm = jax.jit(_pre_norm, static_argnames=("tile_cap",))


def reference(x, w, b, gamma, beta):
    # Pure-f32 PreNorm reference: LayerNorm first, then the Linear sublayer.
    mean = jnp.mean(x, axis=-1, keepdims=True)
    var = jnp.mean((x - mean) ** 2, axis=-1, keepdims=True)
    x_norm = (x - mean) / jnp.sqrt(var + EPS) * gamma + beta
    return jnp.einsum("bsd,de->bse", x_norm, w) + b


def reference_bf16(x, w, b, gamma, beta):
    # Reference that mirrors the kernel's bf16 boundaries (tight correctness check).
    xb = x.astype(jnp.bfloat16).astype(jnp.float32)
    mean = jnp.mean(xb, axis=-1, keepdims=True)
    c = xb - mean
    c2 = (c * c).astype(jnp.bfloat16).astype(jnp.float32)
    var = jnp.mean(c2, axis=-1, keepdims=True)
    x_norm = c * jax.lax.rsqrt(var + EPS) * gamma + beta
    y = jnp.einsum("bsd,de->bse", x_norm.astype(jnp.bfloat16),
                   w.astype(jnp.bfloat16), preferred_element_type=jnp.float32)
    return y + b


if __name__ == "__main__":
    key = jax.random.PRNGKey(0)
    kx, kw, kb, kg, kbe, kx2 = jax.random.split(key, 6)

    B, S, D = 2, 8, 32
    x = jax.random.normal(kx, (B, S, D), dtype=jnp.float32)

    # Deterministic sublayer (Linear) parameters.
    w = jax.random.normal(kw, (D, D), dtype=jnp.float32) * (1.0 / jnp.sqrt(D))
    b = 0.1 * jax.random.normal(kb, (D,), dtype=jnp.float32)

    # LayerNorm affine params (non-trivial to exercise the affine path).
    gamma = 1.0 + 0.1 * jax.random.normal(kg, (D,), dtype=jnp.float32)
    beta = 0.1 * jax.random.normal(kbe, (D,), dtype=jnp.float32)

    # Hoisted parameter prep (done once, reused across calls).
    seg, w_big, affine = prepare_params(w, b, gamma, beta)

    out = jax.block_until_ready(pre_norm(x, seg, w_big, affine))
    assert out.shape == (B, S, D)
    assert jnp.allclose(out, reference_bf16(x, w, b, gamma, beta), atol=5e-3, rtol=5e-3), \
        "small-shape mismatch vs bf16-matched reference"
    assert jnp.allclose(out, reference(x, w, b, gamma, beta), atol=3e-2, rtol=3e-2), \
        "small-shape mismatch vs f32 reference"

    # Larger check: rows not divisible by the pack factor (4) nor by the tile
    # size -> exercises the tiny P-pad, the ragged (Pallas-masked) last tile,
    # and the >=2-tile parallel grid.
    B2, S2 = 5, 413                      # rows = 2065 -> 517 packed rows, 2 tiles
    xl = jax.random.normal(kx2, (B2, S2, D), dtype=jnp.float32)
    outl = jax.block_until_ready(pre_norm(xl, seg, w_big, affine))
    assert outl.shape == (B2, S2, D)
    assert jnp.isfinite(outl).all()
    assert jnp.allclose(outl, reference_bf16(xl, w, b, gamma, beta), atol=5e-3, rtol=5e-3), \
        "tiled mismatch vs bf16-matched reference"
    assert jnp.allclose(outl, reference(xl, w, b, gamma, beta), atol=3e-2, rtol=3e-2), \
        "tiled mismatch vs f32 reference"

    print("KERNEL_OK")
</pallas_src>

<mosaic_0001>
module attributes {stable_mosaic.version = 11 : i64} {
  func.func @prenorm_kernel(%arg0: i32, %arg1: memref<16x128xbf16, #tpu.memory_space<vmem>>, %arg2: memref<128x128xbf16, #tpu.memory_space<vmem>>, %arg3: memref<128x128xbf16, #tpu.memory_space<vmem>>, %arg4: memref<8x128xf32, #tpu.memory_space<vmem>>, %arg5: memref<16x128xf32, #tpu.memory_space<vmem>>) attributes {dimension_semantics = [#tpu.dimension_semantics<parallel>], iteration_bounds = array<i64: 1>, scalar_prefetch = 0 : i64, scratch_operands = 0 : i64, tpu.core_type = #tpu.core_type<tc>, window_params = [{transform_indices = @transform_0, window_bounds = array<i64: 16, 128>}, {pipeline_mode = #tpu.pipeline_mode<synchronous>, transform_indices = @transform_1, window_bounds = array<i64: 128, 128>}, {pipeline_mode = #tpu.pipeline_mode<synchronous>, transform_indices = @transform_2, window_bounds = array<i64: 128, 128>}, {pipeline_mode = #tpu.pipeline_mode<synchronous>, transform_indices = @transform_3, window_bounds = array<i64: 8, 128>}, {transform_indices = @transform_4, window_bounds = array<i64: 16, 128>}]} {
    %c0 = arith.constant 0 : index
    %c0_0 = arith.constant 0 : index
    %0 = vector.load %arg1[%c0, %c0_0] : memref<16x128xbf16, #tpu.memory_space<vmem>>, vector<16x128xbf16>
    %1 = arith.extf %0 : vector<16x128xbf16> to vector<16x128xf32>
    %c0_1 = arith.constant 0 : index
    %c0_2 = arith.constant 0 : index
    %2 = vector.load %arg2[%c0_1, %c0_2] : memref<128x128xbf16, #tpu.memory_space<vmem>>, vector<128x128xbf16>
    %cst = arith.constant dense<0.000000e+00> : vector<16x128xf32>
    %3 = tpu.matmul %0, %2, %cst {dimension_numbers = #tpu.dot_dimension_numbers<[1], [0], [0], [1], [0, 0, 1, 1], [], []>} : vector<16x128xbf16>, vector<128x128xbf16>, vector<16x128xf32> -> vector<16x128xf32>
    %4 = arith.subf %1, %3 : vector<16x128xf32>
    %5 = arith.mulf %4, %4 : vector<16x128xf32>
    %6 = arith.truncf %5 : vector<16x128xf32> to vector<16x128xbf16>
    %cst_3 = arith.constant dense<0.000000e+00> : vector<16x128xf32>
    %7 = tpu.matmul %6, %2, %cst_3 {dimension_numbers = #tpu.dot_dimension_numbers<[1], [0], [0], [1], [0, 0, 1, 1], [], []>} : vector<16x128xbf16>, vector<128x128xbf16>, vector<16x128xf32> -> vector<16x128xf32>
    %c0_4 = arith.constant 0 : index
    %c0_5 = arith.constant 0 : index
    %8 = vector.load %arg4[%c0_4, %c0_5] : memref<8x128xf32, #tpu.memory_space<vmem>>, vector<1x128xf32>
    %c1 = arith.constant 1 : index
    %c0_6 = arith.constant 0 : index
    %9 = vector.load %arg4[%c1, %c0_6] : memref<8x128xf32, #tpu.memory_space<vmem>>, vector<1x128xf32>
    %c2 = arith.constant 2 : index
    %c0_7 = arith.constant 0 : index
    %10 = vector.load %arg4[%c2, %c0_7] : memref<8x128xf32, #tpu.memory_space<vmem>>, vector<1x128xf32>
    %cst_8 = arith.constant 9.99999974E-6 : f32
    %11 = vector.broadcast %cst_8 : f32 to vector<16x128xf32>
    %12 = arith.addf %7, %11 : vector<16x128xf32>
    %13 = math.rsqrt %12 : vector<16x128xf32>
    %14 = arith.mulf %4, %13 : vector<16x128xf32>
    %15 = vector.broadcast %8 : vector<1x128xf32> to vector<16x128xf32>
    %16 = arith.mulf %14, %15 : vector<16x128xf32>
    %17 = vector.broadcast %9 : vector<1x128xf32> to vector<16x128xf32>
    %18 = arith.addf %16, %17 : vector<16x128xf32>
    %19 = arith.truncf %18 : vector<16x128xf32> to vector<16x128xbf16>
    %c0_9 = arith.constant 0 : index
    %c0_10 = arith.constant 0 : index
    %20 = vector.load %arg3[%c0_9, %c0_10] : memref<128x128xbf16, #tpu.memory_space<vmem>>, vector<128x128xbf16>
    %cst_11 = arith.constant dense<0.000000e+00> : vector<16x128xf32>
    %21 = tpu.matmul %19, %20, %cst_11 {dimension_numbers = #tpu.dot_dimension_numbers<[1], [0], [0], [1], [0, 0, 1, 1], [], []>} : vector<16x128xbf16>, vector<128x128xbf16>, vector<16x128xf32> -> vector<16x128xf32>
    %22 = vector.broadcast %10 : vector<1x128xf32> to vector<16x128xf32>
    %23 = arith.addf %21, %22 : vector<16x128xf32>
    %c0_12 = arith.constant 0 : index
    %c0_13 = arith.constant 0 : index
    %24 = vector.load %arg5[%c0_12, %c0_13] : memref<16x128xf32, #tpu.memory_space<vmem>>, vector<16x128xf32>
    tpu.vector_store %arg5[%c0_12, %c0_13], %23 {strides = array<i32>} : memref<16x128xf32, #tpu.memory_space<vmem>>, vector<16x128xf32>,
    return
  }
  func.func @transform_0(%arg0: i32) -> (i32, i32) {
    %c0_i32 = arith.constant 0 : i32
    %c0_i32_0 = arith.constant 0 : i32
    return %arg0, %c0_i32 : i32, i32
  }
  func.func @transform_1(%arg0: i32) -> (i32, i32) {
    %c0_i32 = arith.constant 0 : i32
    %c0_i32_0 = arith.constant 0 : i32
    %c0_i32_1 = arith.constant 0 : i32
    return %c0_i32, %c0_i32_0 : i32, i32
  }
  func.func @transform_2(%arg0: i32) -> (i32, i32) {
    %c0_i32 = arith.constant 0 : i32
    %c0_i32_0 = arith.constant 0 : i32
    %c0_i32_1 = arith.constant 0 : i32
    return %c0_i32, %c0_i32_0 : i32, i32
  }
  func.func @transform_3(%arg0: i32) -> (i32, i32) {
    %c0_i32 = arith.constant 0 : i32
    %c0_i32_0 = arith.constant 0 : i32
    %c0_i32_1 = arith.constant 0 : i32
    return %c0_i32, %c0_i32_0 : i32, i32
  }
  func.func @transform_4(%arg0: i32) -> (i32, i32) {
    %c0_i32 = arith.constant 0 : i32
    %c0_i32_0 = arith.constant 0 : i32
    return %arg0, %c0_i32 : i32, i32
  }
}

</mosaic_0001>

<bundles_post_ra>
// kernel: _pre_norm.1
= control target key start
LH: loop header
LB: loop body
LE: loop exit
PB: predicated region body
PF: predicated region fallthrough
CT: control target
= control target key end

     0   :  { %9 = vsyncpa [#allocation3], 0  ;;  %s714_s0 = inlined_call_operand.vmem [shape: bf16[4,128], index: 0, kind: input, shape index: {}]   ;;  %s715_s1 = inlined_call_operand.hbm [shape: bf16[128,128], index: 1, kind: input, shape index: {}]   ;;  %s716_s2 = inlined_call_operand.hbm [shape: bf16[128,128], index: 2, kind: input, shape index: {}]   ;;  %s717_s3 = inlined_call_operand.vmem [shape: f32[8,128], index: 3, kind: input, shape index: {}]   ;;  %s718_s4 = inlined_call_operand.vmem [shape: f32[4,128], index: 4, kind: output, shape index: {}]  }
   0x1   :  { %10 = vsyncpa [#allocation5], 0  ;;  %s622_s15 = smov [#allocation2]  }
   0x2   :  { %s18_s16 = sshll.u32 %s622_s15, 4  ;;  %s19_s16 = int_to_ptr.vmem [resolvable:$true] %s18_s16 }
   0x3   :  { %s586_s17 = scalar_lea.vmem %s19_s16, 1024  ;;  %p591_p1 = scmp.lt.s32.totalorder %s19_s16, %s19_s16 }
   0x4   :  { %p587_p0 = scmp.ne.s32.totalorder %s19_s16, %s586_s17  ;;  %p592_p2 = scmp.lt.s32.totalorder %s586_s17, %s586_s17 }
   0x6   :  { %p593_p3 = por %p592_p2, %p591_p1 }
   0x8   :  { %p594_p4 = pnand %p593_p3, %p587_p0 }
   0xa   :  { %597 = shalt.err (!%p594_p4)
}
   0xb   :  { %s623_s18 = smov 64   ;;  %s624_s19 = smov 4  }
   0xc   :  { %24 = dma.hbm_to_vmem [thread:$0]  %s715_s1, 1024, %s19_s16, [#allocation3], %s623_s18, %s623_s18, %s624_s19  }
   0xd   :  { %s625_s22 = smov [#allocation4]  }
   0xe   :  { %s30_s23 = sshll.u32 %s625_s22, 4  ;;  %s31_s23 = int_to_ptr.vmem [resolvable:$true] %s30_s23 }
   0xf   :  { %s606_s24 = scalar_lea.vmem %s31_s23, 1024  ;;  %p611_p6 = scmp.lt.s32.totalorder %s31_s23, %s31_s23 }
  0x10   :  { %p607_p5 = scmp.ne.s32.totalorder %s31_s23, %s606_s24  ;;  %p612_p7 = scmp.lt.s32.totalorder %s606_s24, %s606_s24 }
  0x12   :  { %p613_p8 = por %p612_p7, %p611_p6 }
  0x14   :  { %p614_p9 = pnand %p613_p8, %p607_p5 }
  0x16   :  { %617 = shalt.err (!%p614_p9)
}
  0x17   :  { %36 = dma.hbm_to_vmem [thread:$0]  %s716_s2, 1024, %s31_s23, [#allocation5], %s623_s18, %s623_s18, %s624_s19  }
  0x18   :  { %618 = dma.done.wait [#allocation3], 1024  }
  0x19   :  { %619 = vsyncadd [#allocation3], 4294966272 }
  0x1a   :  { %620 = dma.done.wait [#allocation5], 1024  }
  0x1b   :  { %621 = vsyncadd [#allocation5], 4294966272  ;;  %v626_v0 = vmov 0.0   ;;  %vm627_vm0 = vmmov 0   ;;  %v558_v1 = vld [vmem:[#allocation2 + $0x38] sm:$0xff]   ;;  %v559_v2 = vld [vmem:[#allocation2 + $0x30] sm:$0xff]   ;;  %v79_v7 = vlaneseq }
  0x1c   :  { %491 = vmatprep.subr.bf16.mxu0 %v626_v0  ;;  %507 = vmatprep.mubr.msk.bf16.mxu0 %vm627_vm0, %v626_v0  ;;  %v560_v3 = vld [vmem:[#allocation2 + $0x28] sm:$0xff]   ;;  %v561_v4 = vld [vmem:[#allocation2 + $0x20] sm:$0xff]   ;;  %v628_v5 = vmov 1983009808   ;;  %v562_v8 = vld [vmem:[#allocation2 + $0x18] sm:$0xff]  }
  0x1d   :  { %511 = vmatprep.subr.bf16.mxu1 %v626_v0  ;;  %527 = vmatprep.mubr.msk.bf16.mxu1 %vm627_vm0, %v626_v0  ;;  %v77_v6 = vunpack.c.l.s4 %v628_v5  ;;  %v563_v9 = vld [vmem:[#allocation2 + $0x10] sm:$0xff]   ;;  %v46_v10 = vld [vmem:[%s714_s0] sm:$0x3]  ;;  %v80_v12 = vshrl.u32 %v79_v7, 7  ;;  %v47_v13 = vld [vmem:[%s714_s0 + $0x2] sm:$0x3] }
  0x1e   :  { %492 = vmatpush3.bf16.msra.mxu0 %v558_v1  ;;  %512 = vmatpush3.bf16.msra.mxu1 %v558_v1  ;;  %v48_v14 = vld [vmem:[%s714_s0 + $0x4] sm:$0x3]  ;;  %v49_v15 = vld [vmem:[%s714_s0 + $0x6] sm:$0x3]  ;;  %v74_v16 = vcombine.low %v46_v10, %v47_v13  ;;  %v564_v19 = vld [vmem:[#allocation2 + $0x8] sm:$0xff]   ;;  %v51_v24 = vunpack.c.l.bf16 %v47_v13  ;;  %v50_v26 = vunpack.c.l.bf16 %v46_v10 }
  0x1f   :  { %493 = vmatprep.subr.bf16.mxu0 %v626_v0  ;;  %513 = vmatprep.subr.bf16.mxu1 %v626_v0  ;;  %v78_v11 = vunpack.c.0.s8 %v77_v6  ;;  %v75_v17 = vcombine.low %v48_v14, %v49_v15  ;;  %v565_v22 = vld [vmem:[#allocation2] sm:$0xff]   ;;  %v52_v28 = vunpack.c.l.bf16 %v48_v14  ;;  %v53_v31 = vunpack.c.l.bf16 %v49_v15  ;;  %v566_v45 = vld [vmem:[#allocation4 + $0x38] sm:$0xff]   ;;  %v567_v46 = vld [vmem:[#allocation4 + $0x30] sm:$0xff]  }
  0x20   :  { %v568_v47 = vld [vmem:[#allocation4 + $0x28] sm:$0xff]   ;;  %v569_v48 = vld [vmem:[#allocation4 + $0x20] sm:$0xff]   ;;  %v570_v49 = vld [vmem:[#allocation4 + $0x18] sm:$0xff]  }
  0x21   :  { %v81_v18 = vsub.s32 %v78_v11, %v80_v12  ;;  %v571_v50 = vld [vmem:[#allocation4 + $0x10] sm:$0xff]   ;;  %v572_v51 = vld [vmem:[#allocation4 + $0x8] sm:$0xff]   ;;  %v573_v52 = vld [vmem:[#allocation4] sm:$0xff]  }
  0x22   :  { %494 = vmatpush3.bf16.msra.mxu0 %v559_v2  ;;  %514 = vmatpush3.bf16.msra.mxu1 %v559_v2  ;;  %v453_v59 = vld [vmem:[%s717_s3] ss:$0 sm:$0xff]  ;;  %v454_v63 = vld [vmem:[%s717_s3 + $0x1] ss:$0 sm:$0xff] }
  0x23   :  { %495 = vmatprep.subr.bf16.mxu0 %v626_v0  ;;  %515 = vmatprep.subr.bf16.mxu1 %v626_v0  ;;  %v82_v20 = vrot.slane %v74_v16, %v81_v18  ;;  %v89_v21 = vrot.slane %v75_v17, %v81_v18  ;;  %v265_v62 = vcombine.high %v453_v59, %v453_v59  ;;  %v455_v18 = vld [vmem:[%s717_s3 + $0x2] ss:$0 sm:$0xff] }
  0x24   :  { %v276_v6 = vcombine.high %v454_v63, %v454_v63 }
  0x25   :  { %v90_v23 = vcombine.low %v82_v20, %v89_v21 }
  0x26   :  { %496 = vmatpush3.bf16.msra.mxu0 %v560_v3  ;;  %516 = vmatpush3.bf16.msra.mxu1 %v560_v3 }
  0x27   :  { %497 = vmatprep.subr.bf16.mxu0 %v626_v0  ;;  %517 = vmatprep.subr.bf16.mxu1 %v626_v0 }
  0x2a   :  { %498 = vmatpush3.bf16.msra.mxu0 %v561_v4  ;;  %518 = vmatpush3.bf16.msra.mxu1 %v561_v4 }
  0x2b   :  { %499 = vmatprep.subr.bf16.mxu0 %v626_v0  ;;  %519 = vmatprep.subr.bf16.mxu1 %v626_v0 }
  0x2e   :  { %500 = vmatpush3.bf16.msra.mxu0 %v562_v8  ;;  %520 = vmatpush3.bf16.msra.mxu1 %v562_v8 }
  0x2f   :  { %501 = vmatprep.subr.bf16.mxu0 %v626_v0  ;;  %521 = vmatprep.subr.bf16.mxu1 %v626_v0 }
  0x32   :  { %502 = vmatpush3.bf16.msra.mxu0 %v563_v9  ;;  %522 = vmatpush3.bf16.msra.mxu1 %v563_v9 }
  0x33   :  { %503 = vmatprep.subr.bf16.mxu0 %v626_v0  ;;  %523 = vmatprep.subr.bf16.mxu1 %v626_v0 }
  0x36   :  { %504 = vmatpush3.bf16.msra.mxu0 %v564_v19  ;;  %524 = vmatpush3.bf16.msra.mxu1 %v564_v19 }
  0x37   :  { %505 = vmatprep.subr.bf16.mxu0 %v626_v0  ;;  %525 = vmatprep.subr.bf16.mxu1 %v626_v0 }
  0x3a   :  { %506 = vmatpush3.bf16.msra.mxu0 %v565_v22  ;;  %526 = vmatpush3.bf16.msra.mxu1 %v565_v22 }
  0x3b   :  { %531 = vmatprep.subr.bf16.mxu0 %v626_v0 }
  0x3d   :  { %508 = vmatmul.mubr.bf16.vlgmr.msra.gmra.mxu0 %v90_v23 }
  0x3e   :  { %547 = vmatprep.mubr.msk.bf16.mxu0 %vm627_vm0, %v626_v0  ;;  %532 = vmatpush3.bf16.msra.mxu0 %v566_v45 }
  0x3f   :  { %533 = vmatprep.subr.bf16.mxu0 %v626_v0 }
  0x42   :  { %534 = vmatpush3.bf16.msra.mxu0 %v567_v46 }
  0x43   :  { %535 = vmatprep.subr.bf16.mxu0 %v626_v0 }
  0x46   :  { %536 = vmatpush3.bf16.msra.mxu0 %v568_v47 }
  0x47   :  { %537 = vmatprep.subr.bf16.mxu0 %v626_v0 }
  0x4a   :  { %538 = vmatpush3.bf16.msra.mxu0 %v569_v48 }
  0x4b   :  { %539 = vmatprep.subr.bf16.mxu0 %v626_v0 }
  0x4e   :  { %540 = vmatpush3.bf16.msra.mxu0 %v570_v49 }
  0x4f   :  { %541 = vmatprep.subr.bf16.mxu0 %v626_v0 }
  0x52   :  { %542 = vmatpush3.bf16.msra.mxu0 %v571_v50 }
  0x53   :  { %543 = vmatprep.subr.bf16.mxu0 %v626_v0 }
  0x56   :  { %544 = vmatpush3.bf16.msra.mxu0 %v572_v51 }
  0x57   :  { %545 = vmatprep.subr.bf16.mxu0 %v626_v0 }
  0x5a   :  { %546 = vmatpush3.bf16.msra.mxu0 %v573_v52 }
  0xfd   :  { %v174_v25 = vpop.f32.mrf.mxu0 }
  0xfe   :  { %v183_v27 = vcombine.high %v174_v25, %v174_v25  ;;  %v187_v33 = vsub.f32 %v50_v26, %v174_v25 }
  0xff   :  { %v509_v29 = vpop.f32.mrf.mxu0 }
 0x100   :  { %v188_v30 = vsub.f32 %v51_v24, %v183_v27  ;;  %v191_v39 = vmul.f32 %v187_v33, %v187_v33 }
 0x101   :  { %v177_v32 = vpop.f32.mrf.mxu0 }
 0x102   :  { %v184_v34 = vcombine.high %v177_v32, %v177_v32  ;;  %v189_v35 = vsub.f32 %v52_v28, %v177_v32  ;;  %v192_v37 = vmul.f32 %v188_v30, %v188_v30 }
 0x103   :  { %v510_v36 = vpop.f32.mrf.mxu0 }
 0x104   :  { %v190_v38 = vsub.f32 %v53_v31, %v184_v34  ;;  %v193_v40 = vmul.f32 %v189_v35, %v189_v35  ;;  %v199_v42 = vcombine.low %v191_v39, %v192_v37 }
 0x106   :  { %v194_v41 = vmul.f32 %v190_v38, %v190_v38 }
 0x108   :  { %v200_v43 = vcombine.low %v193_v40, %v194_v41 }
 0x10a   :  { %v203_v44 = vpack.c.bf16 %v200_v43, %v199_v42 }
 0x10c   :  { %528 = vmatmul.mubr.bf16.vlgmr.msra.gmra.mxu1 %v203_v44 }
 0x1cc   :  { %v241_v53 = vpop.f32.mrf.mxu1 }
 0x1cd   :  { %v242_v54 = vadd.f32 1e-05, %v241_v53 }
 0x1ce   :  { %v529_v55 = vpop.f32.mrf.mxu1 }
 0x1cf   :  { %574 = vrsqrt.f32 %v242_v54 }
 0x1d0   :  { %v244_v56 = vpop.f32.mrf.mxu1 }
 0x1d1   :  { %v245_v57 = vadd.f32 1e-05, %v244_v56 }
 0x1d2   :  { %v530_v58 = vpop.f32.mrf.mxu1 }
 0x1d3   :  { %576 = vrsqrt.f32 %v245_v57 }
 0x1dc   :  { %v575_v60 = vpop.eup %574 }
 0x1dd   :  { %v252_v61 = vcombine.high %v575_v60, %v575_v60  ;;  %v256_v0 = vmul.f32 %v575_v60, %v187_v33 }
 0x1df   :  { %v257_v1 = vmul.f32 %v252_v61, %v188_v30  ;;  %v267_v8 = vmul.f32 %v453_v59, %v256_v0 }
 0x1e0   :  { %v577_v2 = vpop.eup %576 }
 0x1e1   :  { %v253_v3 = vcombine.high %v577_v2, %v577_v2  ;;  %v258_v4 = vmul.f32 %v577_v2, %v189_v35  ;;  %v268_v5 = vmul.f32 %v265_v62, %v257_v1  ;;  %v278_v12 = vadd.f32 %v454_v63, %v267_v8 }
 0x1e3   :  { %v259_v7 = vmul.f32 %v253_v3, %v190_v38  ;;  %v269_v9 = vmul.f32 %v453_v59, %v258_v4  ;;  %v279_v11 = vadd.f32 %v276_v6, %v268_v5 }
 0x1e5   :  { %v270_v10 = vmul.f32 %v265_v62, %v259_v7  ;;  %v280_v13 = vadd.f32 %v454_v63, %v269_v9  ;;  %v286_v15 = vcombine.low %v278_v12, %v279_v11 }
 0x1e7   :  { %v281_v14 = vadd.f32 %v276_v6, %v270_v10 }
 0x1e9   :  { %v287_v16 = vcombine.low %v280_v13, %v281_v14 }
 0x1eb   :  { %v290_v17 = vpack.c.bf16 %v287_v16, %v286_v15 }
 0x1ed   :  { %548 = vmatmul.mubr.bf16.vlgmr.msra.gmra.mxu0 %v290_v17 }
 0x2ad   :  { %v393_v19 = vpop.f32.mrf.mxu0 }
 0x2ae   :  { %v394_v20 = vadd.f32 %v455_v18, %v393_v19 }
 0x2af   :  { %v549_v21 = vpop.f32.mrf.mxu0 }
 0x2b0   :  { %400 = vst [vmem:[#allocation6] sm:$0xff] %v394_v20 }
 0x2b1   :  { %v396_v22 = vpop.f32.mrf.mxu0 }
 0x2b3   :  { %v550_v23 = vpop.f32.mrf.mxu0 }
 0x2b7   :  { %v420_v24 = vld [vmem:[#allocation6] sm:$0xf] }
 0x2b8   :  { %421 = vst [vmem:[%s718_s4] sm:$0xf] %v420_v24 }
 0x2b9   :  { %439 = vsyncpa [#allocation3], 1 }
 0x2ba   :  { %440 = vsyncpa [#allocation5], 1 }

</bundles_post_ra>
